<compile_context>
chip_gen: v7x
topology: tpu7x:2x2x1
jax: 0.10.0
libtpu: 0.0.40
codegen_flags: <defaults>
</compile_context>

<pallas_src>
import jax
import jax.numpy as jnp
from jax.experimental import pallas as pl
from jax.experimental.pallas import tpu as pltpu

_N_SLOTS = 6                     # number of key fields (Embedding indexed 6x per row)
_N_ROWS = 6                      # rows in the embedding table
_N_OH = _N_SLOTS * _N_ROWS       # 36 one-hot rows
_TBL = _N_OH + 1                 # + constant-1 bias row = 37
_TBL_PAD = 40                    # padded to a sublane multiple (extra cols are zero)
_HI = jax.lax.Precision.HIGHEST


def _inductive_kernel(key_ref, table_ref, w2_ref, b2_ref, y_ref):
    """One batch tile of the folded InductiveModel llm-forward, (dim, tb) layout.

    key_ref   : (6, tb)   int32  transposed keys, values in [0, 6)
    table_ref : (dim, 40) f32    folded table^T: col 6*s+e = (emb[e] @ W1a_s)^T,
                                 col 36 = fused bias b1_eff, cols 37..39 = 0  (resident)
    w2_ref    : (1, dim)  f32    fc2 weight row (resident)
    b2_ref    : (1,)      f32    fc2 bias (SMEM scalar)
    y_ref     : (1, tb)   f32    lane-dense output block
    """
    tb = key_ref.shape[1]

    # ---- (40, tb) one-hot (+ bias row) built with plain VPU compare/selects ----
    # ft[r, b] = 6*s(r) + key[s(r), b]   (s(r) = r // 6 for r < 36), so
    # onehot[r, b] = (ft[r, b] == r).  No integer division, no gather.
    row_iota = jax.lax.broadcasted_iota(jnp.int32, (_TBL_PAD, tb), 0)
    ft = jnp.broadcast_to(key_ref[0:1, :], (_TBL_PAD, tb))
    for s in range(1, _N_SLOTS):
        vs = jnp.broadcast_to(key_ref[s:s + 1, :] + _N_ROWS * s, (_TBL_PAD, tb))
        ft = jnp.where(row_iota >= _N_ROWS * s, vs, ft)
    onehot = (ft == row_iota).astype(jnp.float32)          # rows 0..35: per-slot one-hot
    onehot = jnp.where(row_iota == _N_OH, 1.0, onehot)     # row 36: constant 1 (bias)
    # rows 37..39 stay 0 (their table columns are zero as well).

    # ---- first layer (embedding lookup @ W1a + fused bias) as one MXU matmul ----
    h = jnp.dot(table_ref[...], onehot,
                preferred_element_type=jnp.float32, precision=_HI)    # (dim, tb)
    h = jnp.maximum(h, 0.0)

    # ---- fc2 as an MXU matvec straight into the lane-dense (1, tb) output ----
    y_ref[...] = jnp.dot(w2_ref[...], h,
                         preferred_element_type=jnp.float32, precision=_HI) + b2_ref[0]


def _choose_tb(B):
    """Batch tile on the lane axis: even grid >= 2 when possible, fat tiles otherwise."""
    if B <= 128:
        return max(8, -(-B // 8) * 8)          # single tiny tile, grid = 1
    half = -(-B // 2)                           # split across the 2 v7x TensorCores
    return min(1024, -(-half // 128) * 128)     # 128-aligned, capped for big batches


def inductive_forward(key_idx, params, aug_data, *, tb=None):
    """InductiveModel.embed_with_llm forward.

    key_idx : (B, 6) int32 indices into the 6-row embedding table
    params  : dict of parameters (see init_params)
    aug_data: (1, 5) float32 llm augmentation vector
    """
    emb = params["dnn_embedding"].astype(jnp.float32)        # (6, dim)
    dim = emb.shape[1]
    B = key_idx.shape[0]

    # ---------------- constant folding (plain JAX, independent of B) -----------
    w1 = params["pred_w1"].astype(jnp.float32)               # (7*dim, dim), (in, out)
    w1a, w1b = w1[: _N_SLOTS * dim], w1[_N_SLOTS * dim:]     # dnn rows / info rows

    # info path is batch-invariant -> fold into the first-layer bias.
    info = jnp.dot(aug_data.astype(jnp.float32), params["info_w"],
                   precision=_HI) + params["info_b"]          # (1, dim)
    b1_eff = jnp.dot(info, w1b, precision=_HI) + params["pred_b1"]   # (1, dim)

    # Embedding + fc1 folded into a lookup table; store it transposed with the
    # fused bias as column 36 and zero padding up to 40 columns.
    w1a_r = w1a.reshape(_N_SLOTS, dim, dim)                  # (slot, in, out)
    table = jnp.einsum("ed,sdo->seo", emb, w1a_r, precision=_HI)
    table = table.reshape(_N_OH, dim)                        # row 6*s+e = emb[e] @ W1a_s
    table_t = jnp.concatenate(
        [table.T, b1_eff.reshape(dim, 1),
         jnp.zeros((dim, _TBL_PAD - _TBL), jnp.float32)], axis=1)    # (dim, 40)

    w2_row = params["pred_w2"].reshape(1, dim).astype(jnp.float32)   # (1, dim)
    b2 = params["pred_b2"].reshape(1).astype(jnp.float32)            # (1,) -> SMEM

    # ---------------- batch tiling / padding (lane axis = batch) ---------------
    if tb is None:
        tb = _choose_tb(B)
    tb = int(tb)
    B_pad = -(-B // tb) * tb
    grid_n = B_pad // tb
    assert grid_n == 1 or tb % 128 == 0, "tb must be a multiple of 128 when tiled"

    # Only the int32 keys scale with B (24 bytes/row of HBM traffic).
    key_t = jnp.pad(key_idx.astype(jnp.int32).T, ((0, 0), (0, B_pad - B)))   # (6, B_pad)

    flops = int(B_pad * (2 * dim * _TBL_PAD + 2 * dim))
    bytes_accessed = int(B_pad * (_N_SLOTS * 4 + 4) + dim * _TBL_PAD * 4 + dim * 4 + 4)

    y_row = pl.pallas_call(
        _inductive_kernel,
        out_shape=jax.ShapeDtypeStruct((1, B_pad), jnp.float32),
        grid=(grid_n,),
        in_specs=[
            pl.BlockSpec((_N_SLOTS, tb), lambda i: (0, i)),     # keys (only B-scaled op)
            pl.BlockSpec((dim, _TBL_PAD), lambda i: (0, 0)),    # folded table^T (resident)
            pl.BlockSpec((1, dim), lambda i: (0, 0)),           # fc2 weight row (resident)
            pl.BlockSpec(memory_space=pltpu.MemorySpace.SMEM),  # fc2 bias scalar
        ],
        out_specs=pl.BlockSpec((1, tb), lambda i: (0, i)),      # lane-dense output row
        compiler_params=pltpu.CompilerParams(
            dimension_semantics=("parallel",)),
        cost_estimate=pl.CostEstimate(
            flops=flops, transcendentals=0, bytes_accessed=bytes_accessed),
    )(key_t, table_t, w2_row, b2)

    return y_row.reshape(B_pad, 1)[:B]


def init_params(rng, dim):
    """Deterministic synthetic parameters (shapes follow the module __init__)."""
    ks = jax.random.split(rng, 7)
    scale = 0.1
    return {
        # torch.nn.Embedding(6, dim)
        "dnn_embedding": scale * jax.random.normal(ks[0], (6, dim), jnp.float32),
        # torch.nn.Linear(5, dim)  (stored transposed: (in, out))
        "info_w": scale * jax.random.normal(ks[1], (5, dim), jnp.float32),
        "info_b": scale * jax.random.normal(ks[2], (1, dim), jnp.float32),
        # Predictor(7*dim, dim, 1): Linear(7*dim, dim) -> ReLU -> Linear(dim, 1)
        "pred_w1": scale * jax.random.normal(ks[3], (7 * dim, dim), jnp.float32),
        "pred_b1": scale * jax.random.normal(ks[4], (1, dim), jnp.float32),
        "pred_w2": scale * jax.random.normal(ks[5], (dim, 1), jnp.float32),
        "pred_b2": scale * jax.random.normal(ks[6], (1, 1), jnp.float32),
    }


def _reference_forward(key_idx, params, aug_data):
    """Pure-JAX reference mirroring the PyTorch forward."""
    emb = params["dnn_embedding"]
    dim = emb.shape[1]
    B = key_idx.shape[0]
    dnn = jnp.take(emb, key_idx, axis=0).reshape(B, 6 * dim)
    aug = jnp.broadcast_to(aug_data, (B, 5))
    info = aug @ params["info_w"] + params["info_b"]
    x = jnp.concatenate([dnn, info], axis=1)
    h = jnp.maximum(x @ params["pred_w1"] + params["pred_b1"], 0.0)
    return h @ params["pred_w2"] + params["pred_b2"]


if __name__ == "__main__":
    rng = jax.random.PRNGKey(0)
    k_param, k_key, k_aug = jax.random.split(rng, 3)

    dim = 32          # args.rank
    B = 256           # batch of device-config keys (tb=128 -> grid of 2)

    params = init_params(k_param, dim)
    key_idx = jax.random.randint(k_key, (B, 6), 0, 6, dtype=jnp.int32)
    aug_data = jax.random.normal(k_aug, (1, 5), jnp.float32)

    y = inductive_forward(key_idx, params, aug_data)
    y = jax.block_until_ready(y)

    y_ref = _reference_forward(key_idx, params, aug_data)
    assert y.shape == (B, 1)
    assert jnp.allclose(y, y_ref, atol=1e-4, rtol=1e-3), (
        float(jnp.max(jnp.abs(y - y_ref))))

    print("KERNEL_OK")
</pallas_src>

<mosaic_0001>
module attributes {stable_mosaic.version = 11 : i64} {
  func.func @_inductive_kernel(%arg0: i32, %arg1: memref<6x128xi32, #tpu.memory_space<vmem>>, %arg2: memref<32x40xf32, #tpu.memory_space<vmem>>, %arg3: memref<1x32xf32, #tpu.memory_space<vmem>>, %arg4: memref<1xf32, #tpu.memory_space<smem>>, %arg5: memref<1x128xf32, #tpu.memory_space<vmem>>) attributes {dimension_semantics = [#tpu.dimension_semantics<parallel>], iteration_bounds = array<i64: 2>, scalar_prefetch = 0 : i64, scratch_operands = 0 : i64, tpu.core_type = #tpu.core_type<tc>, window_params = [{transform_indices = @transform_0, window_bounds = array<i64: 6, 128>}, {pipeline_mode = #tpu.pipeline_mode<synchronous>, transform_indices = @transform_1, window_bounds = array<i64: 32, 40>}, {pipeline_mode = #tpu.pipeline_mode<synchronous>, transform_indices = @transform_2, window_bounds = array<i64: 1, 32>}, {transform_indices = @transform_3, window_bounds = array<i64: 1>}, {transform_indices = @transform_4, window_bounds = array<i64: 1, 128>}]} {
    %0 = tpu.iota {dimensions = array<i32: 0>} : vector<40x128xi32>
    %c0 = arith.constant 0 : index
    %c0_0 = arith.constant 0 : index
    %1 = vector.load %arg1[%c0, %c0_0] : memref<6x128xi32, #tpu.memory_space<vmem>>, vector<1x128xi32>
    %2 = vector.shape_cast %1 : vector<1x128xi32> to vector<1x128xi32>
    %3 = vector.broadcast %2 : vector<1x128xi32> to vector<40x128xi32>
    %c1 = arith.constant 1 : index
    %c0_1 = arith.constant 0 : index
    %4 = vector.load %arg1[%c1, %c0_1] : memref<6x128xi32, #tpu.memory_space<vmem>>, vector<1x128xi32>
    %c6_i32 = arith.constant 6 : i32
    %5 = vector.broadcast %c6_i32 : i32 to vector<1x128xi32>
    %6 = arith.addi %4, %5 : vector<1x128xi32>
    %7 = vector.shape_cast %6 : vector<1x128xi32> to vector<1x128xi32>
    %8 = vector.broadcast %7 : vector<1x128xi32> to vector<40x128xi32>
    %c6_i32_2 = arith.constant 6 : i32
    %9 = vector.broadcast %c6_i32_2 : i32 to vector<40x128xi32>
    %10 = arith.cmpi sge, %0, %9 : vector<40x128xi32>
    %11 = arith.select %10, %8, %3 : vector<40x128xi1>, vector<40x128xi32>
    %c2 = arith.constant 2 : index
    %c0_3 = arith.constant 0 : index
    %12 = vector.load %arg1[%c2, %c0_3] : memref<6x128xi32, #tpu.memory_space<vmem>>, vector<1x128xi32>
    %c12_i32 = arith.constant 12 : i32
    %13 = vector.broadcast %c12_i32 : i32 to vector<1x128xi32>
    %14 = arith.addi %12, %13 : vector<1x128xi32>
    %15 = vector.shape_cast %14 : vector<1x128xi32> to vector<1x128xi32>
    %16 = vector.broadcast %15 : vector<1x128xi32> to vector<40x128xi32>
    %c12_i32_4 = arith.constant 12 : i32
    %17 = vector.broadcast %c12_i32_4 : i32 to vector<40x128xi32>
    %18 = arith.cmpi sge, %0, %17 : vector<40x128xi32>
    %19 = arith.select %18, %16, %11 : vector<40x128xi1>, vector<40x128xi32>
    %c3 = arith.constant 3 : index
    %c0_5 = arith.constant 0 : index
    %20 = vector.load %arg1[%c3, %c0_5] : memref<6x128xi32, #tpu.memory_space<vmem>>, vector<1x128xi32>
    %c18_i32 = arith.constant 18 : i32
    %21 = vector.broadcast %c18_i32 : i32 to vector<1x128xi32>
    %22 = arith.addi %20, %21 : vector<1x128xi32>
    %23 = vector.shape_cast %22 : vector<1x128xi32> to vector<1x128xi32>
    %24 = vector.broadcast %23 : vector<1x128xi32> to vector<40x128xi32>
    %c18_i32_6 = arith.constant 18 : i32
    %25 = vector.broadcast %c18_i32_6 : i32 to vector<40x128xi32>
    %26 = arith.cmpi sge, %0, %25 : vector<40x128xi32>
    %27 = arith.select %26, %24, %19 : vector<40x128xi1>, vector<40x128xi32>
    %c4 = arith.constant 4 : index
    %c0_7 = arith.constant 0 : index
    %28 = vector.load %arg1[%c4, %c0_7] : memref<6x128xi32, #tpu.memory_space<vmem>>, vector<1x128xi32>
    %c24_i32 = arith.constant 24 : i32
    %29 = vector.broadcast %c24_i32 : i32 to vector<1x128xi32>
    %30 = arith.addi %28, %29 : vector<1x128xi32>
    %31 = vector.shape_cast %30 : vector<1x128xi32> to vector<1x128xi32>
    %32 = vector.broadcast %31 : vector<1x128xi32> to vector<40x128xi32>
    %c24_i32_8 = arith.constant 24 : i32
    %33 = vector.broadcast %c24_i32_8 : i32 to vector<40x128xi32>
    %34 = arith.cmpi sge, %0, %33 : vector<40x128xi32>
    %35 = arith.select %34, %32, %27 : vector<40x128xi1>, vector<40x128xi32>
    %c5 = arith.constant 5 : index
    %c0_9 = arith.constant 0 : index
    %36 = vector.load %arg1[%c5, %c0_9] : memref<6x128xi32, #tpu.memory_space<vmem>>, vector<1x128xi32>
    %c30_i32 = arith.constant 30 : i32
    %37 = vector.broadcast %c30_i32 : i32 to vector<1x128xi32>
    %38 = arith.addi %36, %37 : vector<1x128xi32>
    %39 = vector.shape_cast %38 : vector<1x128xi32> to vector<1x128xi32>
    %40 = vector.broadcast %39 : vector<1x128xi32> to vector<40x128xi32>
    %c30_i32_10 = arith.constant 30 : i32
    %41 = vector.broadcast %c30_i32_10 : i32 to vector<40x128xi32>
    %42 = arith.cmpi sge, %0, %41 : vector<40x128xi32>
    %43 = arith.select %42, %40, %35 : vector<40x128xi1>, vector<40x128xi32>
    %44 = arith.cmpi eq, %43, %0 : vector<40x128xi32>
    %45 = arith.extui %44 : vector<40x128xi1> to vector<40x128xi32>
    %46 = arith.sitofp %45 : vector<40x128xi32> to vector<40x128xf32>
    %c36_i32 = arith.constant 36 : i32
    %47 = vector.broadcast %c36_i32 : i32 to vector<40x128xi32>
    %48 = arith.cmpi eq, %0, %47 : vector<40x128xi32>
    %cst = arith.constant 1.000000e+00 : f32
    %49 = vector.broadcast %cst : f32 to vector<40x128xf32>
    %50 = arith.select %48, %49, %46 : vector<40x128xi1>, vector<40x128xf32>
    %c0_11 = arith.constant 0 : index
    %c0_12 = arith.constant 0 : index
    %51 = vector.load %arg2[%c0_11, %c0_12] : memref<32x40xf32, #tpu.memory_space<vmem>>, vector<32x40xf32>
    %cst_13 = arith.constant dense<0.000000e+00> : vector<32x128xf32>
    %52 = tpu.matmul %51, %50, %cst_13 {dimension_numbers = #tpu.dot_dimension_numbers<[1], [0], [0], [1], [0, 0, 1, 1], [], []>, precision = #tpu.contract_precision<fp32>} : vector<32x40xf32>, vector<40x128xf32>, vector<32x128xf32> -> vector<32x128xf32>
    %cst_14 = arith.constant 0.000000e+00 : f32
    %53 = vector.broadcast %cst_14 : f32 to vector<32x128xf32>
    %54 = arith.maximumf %52, %53 : vector<32x128xf32>
    %c0_15 = arith.constant 0 : index
    %c0_16 = arith.constant 0 : index
    %55 = vector.load %arg3[%c0_15, %c0_16] : memref<1x32xf32, #tpu.memory_space<vmem>>, vector<1x32xf32>
    %cst_17 = arith.constant dense<0.000000e+00> : vector<1x128xf32>
    %56 = tpu.matmul %55, %54, %cst_17 {dimension_numbers = #tpu.dot_dimension_numbers<[1], [0], [0], [1], [0, 0, 1, 1], [], []>, precision = #tpu.contract_precision<fp32>} : vector<1x32xf32>, vector<32x128xf32>, vector<1x128xf32> -> vector<1x128xf32>
    %c0_18 = arith.constant 0 : index
    %57 = memref.load %arg4[%c0_18] : memref<1xf32, #tpu.memory_space<smem>>
    %58 = vector.broadcast %57 : f32 to vector<1x128xf32>
    %59 = arith.addf %56, %58 : vector<1x128xf32>
    %c0_19 = arith.constant 0 : index
    %c0_20 = arith.constant 0 : index
    %60 = vector.load %arg5[%c0_19, %c0_20] : memref<1x128xf32, #tpu.memory_space<vmem>>, vector<1x128xf32>
    tpu.vector_store %arg5[%c0_19, %c0_20], %59 {strides = array<i32>} : memref<1x128xf32, #tpu.memory_space<vmem>>, vector<1x128xf32>,
    return
  }
  func.func @transform_0(%arg0: i32) -> (i32, i32) {
    %c0_i32 = arith.constant 0 : i32
    %c0_i32_0 = arith.constant 0 : i32
    return %c0_i32, %arg0 : i32, i32
  }
  func.func @transform_1(%arg0: i32) -> (i32, i32) {
    %c0_i32 = arith.constant 0 : i32
    %c0_i32_0 = arith.constant 0 : i32
    %c0_i32_1 = arith.constant 0 : i32
    return %c0_i32, %c0_i32_0 : i32, i32
  }
  func.func @transform_2(%arg0: i32) -> (i32, i32) {
    %c0_i32 = arith.constant 0 : i32
    %c0_i32_0 = arith.constant 0 : i32
    %c0_i32_1 = arith.constant 0 : i32
    return %c0_i32, %c0_i32_0 : i32, i32
  }
  func.func @transform_3(%arg0: i32) -> i32 {
    %c0_i32 = arith.constant 0 : i32
    %c0_i32_0 = arith.constant 0 : i32
    return %c0_i32 : i32
  }
  func.func @transform_4(%arg0: i32) -> (i32, i32) {
    %c0_i32 = arith.constant 0 : i32
    %c0_i32_0 = arith.constant 0 : i32
    return %c0_i32, %arg0 : i32, i32
  }
}

</mosaic_0001>

<bundles_post_ra>
// kernel: tpu_custom_call.1
= control target key start
LH: loop header
LB: loop body
LE: loop exit
PB: predicated region body
PF: predicated region fallthrough
CT: control target
= control target key end

     0   :  { %s2561_s0 = inlined_call_operand.hbm [shape: s32[6,256], index: 0, kind: input, shape index: {}]   ;;  %s2562_s1 = inlined_call_operand.hbm [shape: f32[32,40], index: 1, kind: input, shape index: {}]   ;;  %s2563_s2 = inlined_call_operand.vmem [shape: f32[1,32], index: 2, kind: input, shape index: {}]   ;;  %s2564_s3 = inlined_call_operand.<no memory space> [shape: f32[1], index: 3, kind: input, shape index: {}]   ;;  %s2565_s4 = inlined_call_operand.hbm [shape: f32[1,256], index: 4, kind: output, shape index: {}]  }
   0x1   :  { %9 = sst [smem:[#allocation2]] %s2564_s3 }
   0x2   :  { %10 = vsyncpa [#allocation4], 0 }
   0x3   :  { %12 = vsyncpa [#allocation4 + $0x1], 0 }
   0x4   :  { %13 = vsyncpa [#allocation7], 0 }
   0x5   :  { %14 = vsyncpa [#allocation5], 0 }
   0x6   :  { %16 = vsyncpa [#allocation5 + $0x1], 0  ;;  %s2195_s17 = smov 0   ;;  %s2197_s18 = smov 0  }
   0x7   :  { %s2199_s19 = smov 0   ;;  %s2201_s20 = smov 0  }
   0x8 LB: > { %s2216_s3 = sadd.s32 4294967295, %s2156_s20   ;;  %s1574_s21 = sadd.s32 4294967294, %s2156_s20   ;;  %s2156_s20 = sphi %s2201_s20, %s2589_s20   ;;  %s2152_s19 = sphi %s2199_s19, %s2588_s19   ;;  %s2148_s18 = sphi %s2197_s18, %s2587_s18   ;;  %s2144_s17 = sphi %s2195_s17, %s2586_s17  }
   0x9   : > { %p42_p0 = scmp.ne.s32.totalorder %s2148_s18, %s2144_s17  ;;  %p2566_p1 = scmp.eq.s32.totalorder %s2216_s3, 0 }
   0xa   : > { %p135_p3 = scmp.eq.s32.totalorder %s1574_s21, 1  ;;  %p1575_p5 = scmp.ge.s32.totalorder %s2156_s20, 1 }
   0xb   : > { %p2225_p4 = por %p2566_p1, %p42_p0  ;;  %p142_p7 = scmp.lt.s32.totalorder %s2156_s20, 3 }
   0xc   : > { %p2230_p6 = por %p135_p3, %p42_p0  ;;  %s2158_s25 = smov [#allocation6]  }
   0xd   : > { %s2569_s22 = scalar_select %p2225_p4, 1, 0 }
   0xe   : > { %s2570_s23 = scalar_select %p2230_p6, 1, 0 }
   0xf   : > { %p2235_p8 = pnand %p1575_p5, %p142_p7  ;;  %s154_s26 = sshll.u32 %s2158_s25, 4  ;;  %s2239_s26 = int_to_ptr.vmem [resolvable:$true] %s154_s26 }
  0x10   : > { %s2251_s28 = sadd.s32 1, %s2156_s20   ;;  %s29_s29 = sadd.s32 1, %s2152_s19 }
  0x11   : > { %s2571_s24 = scalar_select %p2235_p8, 1, 0 }
  0x12   : > { %p1973_p9 = pneg %p2235_p8  ;;  %s26_s30 = ssub.s32 %s2156_s20, %s2251_s28 }
  0x13   : > { %s2028_s7 = scalar_lea.hbm %s2562_s1, 512 }
  0x14   : > { %p2246_p11 = pnand %p1973_p9, %p2566_p1  ;;  %p2029_p12 = scmp.ne.s32.totalorder %s2562_s1, %s2028_s7 }
  0x15   : > { %p2035_p5 = scmp.lt.u32.totalorder %s2028_s7, %s2562_s1 }
  0x16   : > { %p2030_p13 = pneg %p2246_p11 }
  0x18   : > { %p2031_p0 = pnand %p2030_p13, %p2029_p12 }
  0x1a   : > { %p2032_p3 = pneg %p2031_p0 }
  0x1c   : > { %p2037_p7 = pnand %p2035_p5, %p2032_p3 }
  0x1e   : > { %2040 = shalt.err (!%p2037_p7)
}
  0x1f   : > { %s2041_s12 = scalar_lea.vmem %s2239_s26, 512  ;;  %p2049_p2 = scmp.lt.s32.totalorder %s2239_s26, %s2239_s26 }
  0x20   : > { %p2042_p9 = scmp.ne.s32.totalorder %s2239_s26, %s2041_s12  ;;  %p2050_p6 = scmp.lt.s32.totalorder %s2041_s12, %s2041_s12 }
  0x22   : > { %p2044_p10 = pnand %p2042_p9, %p2030_p13  ;;  %p2051_p4 = por %p2050_p6, %p2049_p2 }
  0x24   : > { %p2045_p1 = pneg %p2044_p10 }
  0x26   : > { %p2052_p8 = pnand %p2051_p4, %p2045_p1 }
  0x28   : > { %2055 = shalt.err (!%p2052_p8)
}
  0x29   : > { %s2159_s13 = smov 128   ;;  %s2160_s14 = smov 8  }
  0x2a   : > { %1976 = dma.hbm_to_vmem [thread:$0]  (!%p2246_p11), %s2562_s1, 512, %s2239_s26, [#allocation7], %s2159_s13, %s2159_s13, %s2160_s14  }
  0x2b   : > { %p27_p2 = scmp.eq.s32.totalorder %s26_s30, 0  ;;  %p36_p1 = scmp.ne.s32.totalorder %s2152_s19, %s2148_s18 }
  0x2c   : > { %p37_p4 = scmp.eq.s32.totalorder %s2156_s20, 0  ;;  %p1986_p6 = scmp.lt.s32.totalorder %s2156_s20, 2 }
  0x2d   : > { %s2282_s21 = scalar_select %p27_p2, %s2152_s19, %s29_s29  }
  0x2e   : > { %p38_p8 = por %p37_p4, %p36_p1  ;;  %p2573_p10 = scmp.eq.s32.totalorder %s2216_s3, 1 }
  0x2f   : > { %s174_s5 = sand.u32 1, %s2152_s19   ;;  %s1579_s6 = sshll.u32 %s2156_s20, 7 }
  0x30   : > { %p2286_p12 = por %p2573_p10, %p36_p1  ;;  %s1578_s7 = sshll.u32 %s174_s5, 3 }
  0x31   : > { %s2295_s9 = scalar_lea.hbm %s2561_s0, %s1579_s6  ;;  %s178_s26 = scalar_lea.vmem [#allocation3], %s1578_s7 }
  0x32   : > { %s185_s29 = sshll.u32 %s178_s26, 4  ;;  %p2297_p11 = pnand %p1986_p6, %p38_p8  ;;  %s2301_s29 = int_to_ptr.vmem [resolvable:$true] %s185_s29 }
  0x33   : > { %s175_s10 = scalar_lea.sflag [#allocation4], %s174_s5  ;;  %s2056_s11 = scalar_lea.hbm %s2295_s9, 128 }
  0x34   : > { %p2057_p13 = scmp.ne.s32.totalorder %s2295_s9, %s2056_s11  ;;  %p2058_p0 = pneg %p2297_p11 }
  0x35   : > { %s2061_s14 = scalar_lea.hbm %s2561_s0, 256  ;;  %p2062_p7 = scmp.lt.u32.totalorder %s2295_s9, %s2561_s0 }
  0x36   : > { %p2059_p3 = pnand %p2058_p0, %p2057_p13  ;;  %p2063_p9 = scmp.lt.u32.totalorder %s2061_s14, %s2056_s11 }
  0x37   : > { %p2065_p1 = scmp.lt.u32.totalorder %s2056_s11, %s2295_s9 }
  0x38   : > { %p2060_p5 = pneg %p2059_p3  ;;  %p2064_p2 = por %p2063_p9, %p2062_p7 }
  0x3a   : > { %p2066_p4 = por %p2065_p1, %p2064_p2 }
  0x3c   : > { %p2067_p6 = pnand %p2066_p4, %p2060_p5 }
  0x3e   : > { %2070 = shalt.err (!%p2067_p6)
}
  0x3f   : > { %s2071_s5 = scalar_lea.vmem %s2301_s29, 128  ;;  %s2161_s6 = smov [#allocation3]  }
  0x40   : > { %p2072_p8 = scmp.ne.s32.totalorder %s2301_s29, %s2071_s5  ;;  %s2076_s7 = sshll.u32 %s2161_s6, 4  ;;  %s2077_s7 = int_to_ptr.vmem [resolvable:$false] %s2076_s7 }
  0x41   : > { %s2078_s27 = scalar_lea.vmem %s2077_s7, 256  ;;  %p2079_p3 = scmp.lt.s32.totalorder %s2301_s29, %s2077_s7 }
  0x42   : > { %p2074_p10 = pnand %p2072_p8, %p2058_p0  ;;  %p2080_p7 = scmp.lt.s32.totalorder %s2078_s27, %s2071_s5 }
  0x44   : > { %p2075_p13 = pneg %p2074_p10  ;;  %p2081_p9 = por %p2080_p7, %p2079_p3 }
  0x46   : > { %p2082_p2 = pnand %p2081_p9, %p2075_p13 }
  0x48   : > { %2085 = shalt.err (!%p2082_p2)
}
  0x49   : > { %1980 = dma.hbm_to_vmem [thread:$0]  (!%p2297_p11), %s2295_s9, 128, %s2301_s29, %s175_s10  }
  0x4a   : > { %p2576_p5 = scmp.ne.s32.totalorder %s2571_s24, 0 }
  0x4b   : > { %s2331_s8 = sand.u32 (!%p2576_p5), 1, %s2148_s18   ;;  %p2577_p0 = scmp.ne.s32.totalorder (!%p2576_p5), %s2569_s22, 0 }
  0x4c   : > { %194 = sbr.rel (%p2576_p5) target bundleno = 654 (0x28e), region = 36  ;;  %s1581_s26 = sshll.u32 (!%p2576_p5), %s2331_s8, 3 }
  0x4d   : > { %s197_s11 = scalar_lea.sflag (!%p2576_p5), [#allocation4], %s2331_s8  ;;  %s200_s12 = scalar_lea.vmem (!%p2576_p5), [#allocation3], %s1581_s26 }
  0x53   : > { %2131 = dma.done.wait (%p2577_p0), %s197_s11, 128  }
  0x54   : > { %2133 = vsyncadd (%p2577_p0), %s197_s11, 4294967168  ;;  %p2578_p1 = scmp.eq.s32.totalorder %s2216_s3, 0 }
  0x56   : > { %2135 = dma.done.wait (%p2578_p1), [#allocation7], 512   ;;  %p2579_p11 = pmov %p2578_p1 }
  0x57   : > { %v228_v0 = vlaneseq  ;;  %vm348_vm0 = vcmask 326656   ;;  %v239_v6 = vld [vmem:[%s200_s12 + $0x1] sm:$0x1]  ;;  %v255_v7 = vld [vmem:[%s200_s12 + $0x2] sm:$0x1]  ;;  %v344_v20 = vld [vmem:[#allocation6] sm:$0xff] }
  0x58   : > { %2137 = vsyncadd (%p2579_p11), [#allocation7], 4294966784  ;;  %v240_v9 = vadd.s32 6, %v239_v6  ;;  %v256_v10 = vadd.s32 12, %v255_v7  ;;  %v271_v11 = vld [vmem:[%s200_s12 + $0x3] sm:$0x1] }
  0x59   : > { %v229_v1 = vshrl.u32 %v228_v0, 7  ;;  %v287_v12 = vld [vmem:[%s200_s12 + $0x4] sm:$0x1]  ;;  %v1583_v13 = vld [vmem:[%s200_s12] ss:$0 sm:$0xff]  ;;  %v272_v14 = vadd.s32 18, %v271_v11 }
  0x5a   : > { %v288_v15 = vadd.s32 24, %v287_v12  ;;  %v303_v16 = vld [vmem:[%s200_s12 + $0x5] sm:$0x1]  ;;  %v350_v23 = vsel %vm348_vm0, %v344_v20, 0  ;;  %v345_v29 = vld [vmem:[#allocation6 + $0x8] sm:$0xff]  ;;  %v2162_v30 = vmov 0.0  }
  0x5b   : > { %v230_v2 = vadd.s32 8, %v229_v1  ;;  %v243_v3 = vsub.s32 0, %v229_v1  ;;  %vm245_vm1 = vcmp.ge.s32.totalorder %v229_v1, 6  ;;  %v231_v4 = vadd.s32 16, %v229_v1  ;;  %v346_v37 = vld [vmem:[#allocation6 + $0x10] sm:$0xff]  ;;  %v347_v48 = vld [vmem:[#allocation6 + $0x18] sm:$0xff] }
  0x5c   : > { %v232_v5 = vadd.s32 24, %v229_v1  ;;  %v233_v8 = vadd.s32 32, %v229_v1  ;;  %v304_v19 = vadd.s32 30, %v303_v16  ;;  %v2346_v27 = vand.u32 4294901760, %v350_v23  ;;  %s993_s9 = sld [smem:[#allocation2]]  ;;  %s1601_s29 = sshll.u32 %s2216_s3, 4 }
  0x5d   : > { %vm262_vm2 = vcmp.ge.s32.totalorder %v230_v2, 12  ;;  %v244_v17 = vrot.slane %v240_v9, %v243_v3  ;;  %v260_v18 = vrot.slane %v256_v10, %v243_v3  ;;  %vm279_vm3 = vcmp.ge.s32.totalorder %v231_v4, 18  ;;  %s227_s30 = scalar_lea.vmem [#allocation8], %s2331_s8  ;;  %s2517_s15 = scalar_lea.hbm %s2565_s4, %s1601_s29 }
  0x5e   : > { %v276_v21 = vrot.slane %v272_v14, %v243_v3  ;;  %v292_v22 = vrot.slane %v288_v15, %v243_v3  ;;  %vm312_vm4 = vcmp.ge.s32.totalorder %v232_v5, 30  ;;  %v308_v26 = vrot.slane %v304_v19, %v243_v3  ;;  %1714 = vmatprep.mubr.f32.mxu0 %v2346_v27  ;;  %s1498_s10 = sshll.u32 %s227_s30, 4  ;;  %s1486_s16 = scalar_lea.sflag [#allocation5], %s2331_s8  ;;  %s2519_s10 = int_to_ptr.vmem [resolvable:$true] %s1498_s10 }
  0x5f   : > { %v250_v24 = vsel %vm245_vm1, %v244_v17, %v1583_v13  ;;  %v267_v25 = vsel %vm262_vm2, %v260_v18, %v244_v17  ;;  %vm338_vm7 = vcmp.eq.s32.totalorder %v233_v8, 36  ;;  %v2163_v38 = vmov 1.0|1.0   ;;  %s2086_s5 = scalar_lea.vmem %s2519_s10, 16  ;;  %s2166_s3 = smov [#allocation8]  }
  0x60   : > { %vm319_vm5 = vcmp.eq.s32.totalorder %v250_v24, %v229_v1  ;;  %vm320_vm6 = vcmp.eq.s32.totalorder %v267_v25, %v230_v2  ;;  %v284_v28 = vsel %vm279_vm3, %v276_v21, %v260_v18  ;;  %v317_v33 = vsel %vm312_vm4, %v308_v26, %v292_v22  ;;  %p2087_p4 = scmp.ne.s32.totalorder %s2519_s10, %s2086_s5  ;;  %s2090_s6 = sshll.u32 %s2166_s3, 4  ;;  %s2091_s6 = int_to_ptr.vmem [resolvable:$false] %s2090_s6 }
  0x61   : > { %v1584_v31 = vsel %vm319_vm5, 1.0, %v2162_v30  ;;  %v1585_v32 = vsel %vm320_vm6, 1.0, %v2162_v30  ;;  %vm321_vm8 = vcmp.eq.s32.totalorder %v284_v28, %v231_v4  ;;  %vm2351_vm9 = vmpackc.low %vm320_vm6, %vm319_vm5  ;;  %vm322_vm10 = vcmp.eq.s32.totalorder %v317_v33, %v232_v5  ;;  %v992_v33 = vld [vmem:[%s2563_s2] sm:$0x1]  ;;  %s2092_s7 = scalar_lea.vmem %s2091_s6, 32  ;;  %p2093_p10 = scmp.lt.s32.totalorder %s2519_s10, %s2091_s6 }
  0x62   : > { %v2355_v35 = vsub.f32 %v1584_v31, %v1584_v31  ;;  %v2357_v36 = vsub.f32 %v1585_v32, %v1585_v32  ;;  %vm323_vm11 = vcmp.eq.s32.totalorder %v308_v26, %v233_v8  ;;  %1851 = vmatprep.subr.msk.bf16.mxu1 %vm2351_vm9, %v2163_v38  ;;  %v1586_v39 = vsel %vm321_vm8, 1.0, %v2162_v30  ;;  %vm2366_vm12 = vmpackc.low %vm322_vm10, %vm321_vm8  ;;  %p2088_p6 = pnand %p2087_p4, %p2286_p12  ;;  %p2094_p13 = scmp.lt.s32.totalorder %s2092_s7, %s2086_s5 }
  0x63   : > { %v1587_v40 = vsel %vm322_vm10, 1.0, %v2162_v30  ;;  %v1588_v41 = vsel %vm323_vm11, 1.0, %v2162_v30  ;;  %v353_v42 = vsel %vm348_vm0, %v345_v29, 0  ;;  %1853 = vmatpush3.bf16.msk.msra.mxu1 %vm2351_vm9, %v2163_v38  ;;  %v2378_v47 = vsub.f32 %v1586_v39, %v1586_v39 }
  0x64   : > { %v474_v44 = vand.u32 4294901760, %v2355_v35  ;;  %v481_v45 = vand.u32 4294901760, %v2357_v36  ;;  %v2376_v46 = vsel %vm338_vm7, 1.0, %v1588_v41  ;;  %1855 = vmatprep.subr.msk.bf16.mxu1 %vm2366_vm12, %v2163_v38  ;;  %v2383_v49 = vsub.f32 %v1587_v40, %v1587_v40  ;;  %p2089_p8 = pneg %p2088_p6  ;;  %p2095_p3 = por %p2094_p13, %p2093_p10 }
  0x65   : > { %v501_v50 = vsub.f32 %v2376_v46, %v2376_v46  ;;  %v356_v51 = vsel %vm348_vm0, %v346_v37, 0  ;;  %v488_v54 = vand.u32 4294901760, %v2378_v47  ;;  %v2398_v57 = vand.u32 4294901760, %v353_v42 }
  0x66   : > { %v475_v52 = vsub.f32 %v2355_v35, %v474_v44  ;;  %v482_v53 = vsub.f32 %v2357_v36, %v481_v45  ;;  %v495_v55 = vand.u32 4294901760, %v2383_v49  ;;  %v359_v58 = vsel %vm348_vm0, %v347_v48, 0  ;;  %p2096_p7 = pnand %p2095_p3, %p2089_p8 }
  0x67   : > { %v2396_v56 = vand.u32 4294901760, %v501_v50  ;;  %1857 = vmatpush3.bf16.msk.msra.mxu1 %vm2366_vm12, %v2163_v38  ;;  %v489_v61 = vsub.f32 %v2378_v47, %v488_v54  ;;  %v2407_v62 = vand.u32 4294901760, %v356_v51  ;;  %v442_v0 = vsub.f32 %v353_v42, %v2398_v57 }
  0x68   : > { %v476_v59 = vand.u32 4294901760, %v475_v52  ;;  %v483_v60 = vand.u32 4294901760, %v482_v53  ;;  %1696 = vmatprep.subr.mxu1 %v2376_v46  ;;  %v496_v63 = vsub.f32 %v2383_v49, %v495_v55  ;;  %v2414_v1 = vand.u32 4294901760, %v359_v58 }
  0x69   : > { %v432_v2 = vsub.f32 %v350_v23, %v2346_v27  ;;  %v490_v4 = vand.u32 4294901760, %v489_v61  ;;  %v503_v5 = vsub.f32 %v501_v50, %v2396_v56  ;;  %v452_v6 = vsub.f32 %v356_v51, %v2407_v62 }
  0x6a   : > { %v1858_v3 = vpack.c.bf16 %v483_v60, %v476_v59  ;;  %v497_v7 = vand.u32 4294901760, %v496_v63  ;;  %v443_v9 = vand.u32 4294901760, %v442_v0  ;;  %v462_v10 = vsub.f32 %v359_v58, %v2414_v1 }
  0x6b   : > { %v433_v8 = vand.u32 4294901760, %v432_v2  ;;  %1697 = vmatpush3.msra.mxu1 %v2376_v46  ;;  %v453_v11 = vand.u32 4294901760, %v452_v6  ;;  %v504_v15 = vand.u32 4294901760, %v503_v5  ;;  %v1866_v22 = vpack.c.bf16 %v2357_v36, %v2355_v35 }
  0x6c   : > { %1859 = vmatprep.subr.bf16.mxu0 %v1858_v3  ;;  %v1862_v12 = vpack.c.bf16 %v497_v7, %v490_v4  ;;  %v444_v14 = vsub.f32 %v442_v0, %v443_v9  ;;  %v463_v16 = vand.u32 4294901760, %v462_v10  ;;  %v1870_v23 = vpack.c.bf16 %v2383_v49, %v2378_v47 }
  0x6d   : > { %1861 = vmatpush3.bf16.msra.mxu0 %v1858_v3  ;;  %v434_v13 = vsub.f32 %v432_v2, %v433_v8  ;;  %v454_v17 = vsub.f32 %v452_v6, %v453_v11  ;;  %v1882_v25 = vpack.c.bf16 %v481_v45, %v474_v44  ;;  %v1886_v26 = vpack.c.bf16 %v495_v55, %v488_v54 }
  0x6e   : > { %1863 = vmatprep.subr.bf16.mxu0 %v1862_v12  ;;  %v445_v19 = vand.u32 4294901760, %v444_v14  ;;  %v464_v21 = vsub.f32 %v462_v10, %v463_v16  ;;  %v2164_v28 = vmov 0.0|0.0   ;;  %vm2165_vm13 = vmmov 0  }
  0x6f   : > { %v435_v18 = vand.u32 4294901760, %v434_v13  ;;  %v455_v20 = vand.u32 4294901760, %v454_v17  ;;  %1898 = vmatprep.subr.bf16.mxu1 %v2164_v28  ;;  %vm995_vm14 = vcmask 261120  }
  0x70   : > { %v465_v24 = vand.u32 4294901760, %v464_v21  ;;  %v997_v34 = vsel %vm995_vm14, %v992_v33, 0 }
  0x71   : > { %1865 = vmatpush3.bf16.msra.mxu0 %v1862_v12  ;;  %1698 = vmatprep.mubr.f32.mxu1 %v435_v18  ;;  %v2480_v35 = vand.u32 4294901760, %v997_v34 }
  0x72   : > { %1712 = vmatprep.subr.mxu0 %v504_v15  ;;  %1699 = vmatmul.mubr.f32.vlgmr.msra.gmra.mrb[0].mxu1 %v445_v19 }
  0x73   : > { %1701 = vmatprep.mubr.f32.mxu1 %v455_v20  ;;  %v2483_v39 = vsub.f32 %v997_v34, %v2480_v35 }
  0x75   : > { %1713 = vmatpush3.msra.mxu0 %v504_v15  ;;  %v1070_v47 = vand.u32 4294901760, %v2483_v39 }
  0x76   : > { %1867 = vmatprep.subr.bf16.mxu0 %v1866_v22  ;;  %1715 = vmatmul.mubr.f32.vlgmr.msra.gmra.mrb[0].mxu0 %v2398_v57 }
  0x77   : > { %1869 = vmatpush3.bf16.msra.mxu0 %v1866_v22  ;;  %1717 = vmatprep.mubr.f32.mxu0 %v2407_v62 }
  0x78   : > { %1871 = vmatprep.subr.bf16.mxu0 %v1870_v23  ;;  %1702 = vmatmul.mubr.f32.gmra.mrb[2].mxu1 %v465_v24 }
  0x79   : > { %1792 = vmatprep.mubr.msk.f32.mxu1 %vm2165_vm13, %v2162_v30 }
  0x7a   : > { %1718 = vmatmul.mubr.f32.gmra.mrb[2].mxu0 %v2414_v1 }
  0x7b   : > { %1873 = vmatpush3.bf16.msra.mxu0 %v1870_v23  ;;  %1730 = vmatprep.mubr.f32.mxu0 %v432_v2 }
  0x7c   : > { %1728 = vmatprep.subr.mxu0 %v501_v50 }
  0x7f   : > { %1729 = vmatpush3.msra.mxu0 %v501_v50 }
  0x80   : > { %1875 = vmatprep.subr.msk.bf16.mxu0 %vm2351_vm9, %v2163_v38  ;;  %1731 = vmatmul.mubr.f32.vlgmr.msra.gmra.mrb[0].mxu0 %v442_v0 }
  0x81   : > { %1877 = vmatpush3.bf16.msk.msra.mxu0 %vm2351_vm9, %v2163_v38  ;;  %1733 = vmatprep.mubr.f32.mxu0 %v452_v6 }
  0x82   : > { %1879 = vmatprep.subr.msk.bf16.mxu0 %vm2366_vm12, %v2163_v38 }
  0x84   : > { %1734 = vmatmul.mubr.f32.gmra.mrb[2].mxu0 %v462_v10 }
  0x85   : > { %1881 = vmatpush3.bf16.msk.msra.mxu0 %vm2366_vm12, %v2163_v38  ;;  %1746 = vmatprep.mubr.f32.mxu0 %v433_v8 }
  0x86   : > { %1744 = vmatprep.subr.mxu0 %v2376_v46 }
  0x89   : > { %1745 = vmatpush3.msra.mxu0 %v2376_v46 }
  0x8a   : > { %1883 = vmatprep.subr.bf16.mxu0 %v1882_v25  ;;  %1747 = vmatmul.mubr.f32.vlgmr.msra.gmra.mrb[0].mxu0 %v443_v9 }
  0x8b   : > { %1885 = vmatpush3.bf16.msra.mxu0 %v1882_v25  ;;  %1749 = vmatprep.mubr.f32.mxu0 %v453_v11 }
  0x8c   : > { %1887 = vmatprep.subr.bf16.mxu0 %v1886_v26 }
  0x8e   : > { %1750 = vmatmul.mubr.f32.gmra.mrb[2].mxu0 %v463_v16  ;;  %v994_v16 = vstv %s993_s9 }
  0x8f   : > { %1889 = vmatpush3.bf16.msra.mxu0 %v1886_v26  ;;  %1762 = vmatprep.mubr.f32.mxu0 %v2346_v27 }
  0x90   : > { %1760 = vmatprep.subr.mxu0 %v2396_v56 }
  0x93   : > { %1761 = vmatpush3.msra.mxu0 %v2396_v56 }
  0x94   : > { %1891 = vmatprep.subr.msk.bf16.mxu0 %vm2351_vm9, %v2163_v38  ;;  %1763 = vmatmul.mubr.f32.vlgmr.msra.gmra.mrb[0].mxu0 %v2398_v57 }
  0x95   : > { %1893 = vmatpush3.bf16.msk.msra.mxu0 %vm2351_vm9, %v2163_v38  ;;  %1765 = vmatprep.mubr.f32.mxu0 %v2407_v62 }
  0x96   : > { %1895 = vmatprep.subr.msk.bf16.mxu0 %vm2366_vm12, %v2163_v38 }
  0x98   : > { %1766 = vmatmul.mubr.f32.gmra.mrb[2].mxu0 %v2414_v1 }
  0x99   : > { %1897 = vmatpush3.bf16.msk.msra.mxu0 %vm2366_vm12, %v2163_v38  ;;  %1778 = vmatprep.mubr.f32.mxu0 %v2346_v27 }
  0x9a   : > { %1776 = vmatprep.subr.mxu0 %v2376_v46 }
  0x9d   : > { %1777 = vmatpush3.msra.mxu0 %v2376_v46 }
  0x9e   : > { %1779 = vmatmul.mubr.f32.vlgmr.msra.gmra.mrb[0].mxu0 %v2398_v57  ;;  %v1071_v57 = vsub.f32 %v2483_v39, %v1070_v47 }
  0x9f   : > { %1781 = vmatprep.mubr.f32.mxu0 %v2407_v62 }
  0xa0   : > { %v1072_v5 = vand.u32 4294901760, %v1071_v57 }
  0xa2   : > { %1782 = vmatmul.mubr.f32.gmra.mrb[2].mxu0 %v2414_v1 }
 0x145   : > { %v1700_v29 = vpop.f32.mrb[0].mxu1 }
 0x146   : > { %v437_v31 = vpop.f32.mrb[1].mxu1 }
 0x14b   : > { %v1703_v27 = vpop.f32.mrb[2].mxu1 }
 0x14c   : > { %v457_v32 = vpop.f32.mrb[3].mxu1 }
 0x171   : > { %v1780_v36 = vpop.f32.mrb[0].mxu0 }
 0x172   : > { %v1934_v37 = vadd.f32 %v1780_v36, %v1700_v29  ;;  %v966_v38 = vpop.f32.mrb[1].mxu0 }
 0x173   : > { %v1935_v40 = vadd.f32 %v966_v38, %v437_v31 }
 0x174   : > { %v989_v41 = vmax.f32 %v1934_v37, 0.0 }
 0x175   : > { %v988_v42 = vmax.f32 %v1935_v40, 0.0  ;;  %v1783_v43 = vpop.f32.mrb[2].mxu0 }
 0x176   : > { %v1003_v44 = vand.u32 4294901760, %v989_v41  ;;  %v1936_v45 = vadd.f32 %v1783_v43, %v1703_v27  ;;  %v978_v46 = vpop.f32.mrb[3].mxu0 }
 0x177   : > { %v1000_v48 = vand.u32 4294901760, %v988_v42  ;;  %v1937_v49 = vadd.f32 %v978_v46, %v457_v32 }
 0x178   : > { %v1087_v50 = vsub.f32 %v989_v41, %v1003_v44  ;;  %v991_v51 = vmax.f32 %v1936_v45, 0.0 }
 0x179   : > { %v1899_v52 = vpack.c.bf16 %v1003_v44, %v1000_v48  ;;  %v1080_v53 = vsub.f32 %v988_v42, %v1000_v48  ;;  %v990_v54 = vmax.f32 %v1937_v49, 0.0 }
 0x17a   : > { %v1088_v55 = vand.u32 4294901760, %v1087_v50  ;;  %v1009_v56 = vand.u32 4294901760, %v991_v51 }
 0x17b   : > { %v1081_v58 = vand.u32 4294901760, %v1080_v53  ;;  %v1006_v59 = vand.u32 4294901760, %v990_v54  ;;  %1900 = vmatpush3.bf16.msra.mxu1 %v1899_v52  ;;  %v1911_v60 = vpack.c.bf16 %v1087_v50, %v1080_v53 }
 0x17c   : > { %v1089_v61 = vsub.f32 %v1087_v50, %v1088_v55  ;;  %v1101_v62 = vsub.f32 %v991_v51, %v1009_v56  ;;  %1901 = vmatprep.subr.bf16.mxu1 %v2164_v28 }
 0x17d   : > { %v1082_v63 = vsub.f32 %v1080_v53, %v1081_v58  ;;  %v1902_v0 = vpack.c.bf16 %v1009_v56, %v1006_v59  ;;  %v1094_v1 = vsub.f32 %v990_v54, %v1006_v59  ;;  %v1923_v2 = vpack.c.bf16 %v1088_v55, %v1081_v58 }
 0x17e   : > { %v1090_v3 = vand.u32 4294901760, %v1089_v61  ;;  %v1102_v4 = vand.u32 4294901760, %v1101_v62 }
 0x17f   : > { %v1083_v6 = vand.u32 4294901760, %v1082_v63  ;;  %v1095_v7 = vand.u32 4294901760, %v1094_v1  ;;  %1903 = vmatpush3.bf16.msra.mxu1 %v1902_v0  ;;  %v1914_v8 = vpack.c.bf16 %v1101_v62, %v1094_v1 }
 0x180   : > { %v1103_v9 = vsub.f32 %v1101_v62, %v1102_v4  ;;  %1904 = vmatprep.subr.bf16.mxu1 %v2164_v28 }
 0x181   : > { %v1096_v10 = vsub.f32 %v1094_v1, %v1095_v7  ;;  %v1905_v11 = vpack.c.bf16 %v1090_v3, %v1083_v6  ;;  %v1926_v12 = vpack.c.bf16 %v1102_v4, %v1095_v7 }
 0x182   : > { %v1104_v13 = vand.u32 4294901760, %v1103_v9  ;;  %1793 = vmatmul.mubr.f32.vlgmr.msra.gmra.mrb[4].mxu1 %v1072_v5 }
 0x183   : > { %v1097_v14 = vand.u32 4294901760, %v1096_v10  ;;  %1906 = vmatpush3.bf16.msra.mxu1 %v1905_v11  ;;  %1803 = vmatprep.mubr.msk.f32.mxu1 %vm2165_vm13, %v2162_v30 }
 0x184   : > { %1907 = vmatprep.subr.bf16.mxu1 %v2164_v28 }
 0x185   : > { %v1908_v15 = vpack.c.bf16 %v1104_v13, %v1097_v14 }
 0x187   : > { %1909 = vmatpush3.bf16.msra.mxu1 %v1908_v15 }
 0x188   : > { %1910 = vmatprep.subr.bf16.mxu1 %v2164_v28 }
 0x18a   : > { %1804 = vmatmul.mubr.f32.vlgmr.msra.gmra.mrb[4].mxu1 %v2480_v35 }
 0x18b   : > { %1912 = vmatpush3.bf16.msra.mxu1 %v1911_v60  ;;  %1814 = vmatprep.mubr.msk.f32.mxu1 %vm2165_vm13, %v2162_v30 }
 0x18c   : > { %1913 = vmatprep.subr.bf16.mxu1 %v2164_v28 }
 0x18f   : > { %1915 = vmatpush3.bf16.msra.mxu1 %v1914_v8 }
 0x190   : > { %1916 = vmatprep.subr.bf16.mxu1 %v2164_v28 }
 0x192   : > { %1815 = vmatmul.mubr.f32.vlgmr.msra.gmra.mrb[4].mxu1 %v2483_v39 }
 0x193   : > { %1918 = vmatpush3.bf16.msra.mxu1 %v1899_v52  ;;  %1825 = vmatprep.mubr.msk.f32.mxu1 %vm2165_vm13, %v2162_v30 }
 0x194   : > { %1919 = vmatprep.subr.bf16.mxu1 %v2164_v28 }
 0x197   : > { %1921 = vmatpush3.bf16.msra.mxu1 %v1902_v0 }
 0x198   : > { %1922 = vmatprep.subr.bf16.mxu1 %v2164_v28 }
 0x19a   : > { %1826 = vmatmul.mubr.f32.vlgmr.msra.gmra.mrb[4].mxu1 %v1070_v47 }
 0x19b   : > { %1924 = vmatpush3.bf16.msra.mxu1 %v1923_v2  ;;  %1836 = vmatprep.mubr.msk.f32.mxu1 %vm2165_vm13, %v2162_v30 }
 0x19c   : > { %1925 = vmatprep.subr.bf16.mxu1 %v2164_v28 }
 0x19f   : > { %1927 = vmatpush3.bf16.msra.mxu1 %v1926_v12 }
 0x1a0   : > { %1928 = vmatprep.subr.bf16.mxu1 %v2164_v28 }
 0x1a2   : > { %1837 = vmatmul.mubr.f32.vlgmr.msra.gmra.mrb[4].mxu1 %v2480_v35 }
 0x1a3   : > { %1930 = vmatpush3.bf16.msra.mxu1 %v1899_v52  ;;  %1847 = vmatprep.mubr.msk.f32.mxu1 %vm2165_vm13, %v2162_v30 }
 0x1a4   : > { %1931 = vmatprep.subr.bf16.mxu1 %v2164_v28 }
 0x1a7   : > { %1933 = vmatpush3.bf16.msra.mxu1 %v1902_v0 }
 0x1aa   : > { %1848 = vmatmul.mubr.f32.vlgmr.msra.gmra.mrb[4].mxu1 %v2480_v35 }
 0x27d   : > { %v1480_v17 = vpop.f32.mrb[4].mxu1 }
 0x27e   : > { %v1938_v18 = vadd.f32 %v1480_v17, %v994_v16  ;;  %v1849_v19 = vpop.f32.mrb[5].mxu1 }
 0x280   : > { %1484 = vst [vmem:[%s227_s30] sm:$0x1] %v1938_v18 }
 0x281   : > { %2099 = shalt.err (!%p2096_p7)
}
 0x282   : > { %s2100_s27 = scalar_lea.hbm %s2517_s15, 16  ;;  %s2104_s11 = scalar_lea.hbm %s2565_s4, 32 }
 0x283   : > { %p2101_p9 = scmp.ne.s32.totalorder %s2517_s15, %s2100_s27  ;;  %p2105_p0 = scmp.lt.u32.totalorder %s2517_s15, %s2565_s4 }
 0x284   : > { %p2106_p1 = scmp.lt.u32.totalorder %s2104_s11, %s2100_s27  ;;  %p2108_p4 = scmp.lt.u32.totalorder %s2100_s27, %s2517_s15 }
 0x285   : > { %p2102_p2 = pnand %p2101_p9, %p2286_p12 }
 0x286   : > { %p2107_p11 = por %p2106_p1, %p2105_p0 }
 0x287   : > { %p2103_p5 = pneg %p2102_p2 }
 0x288   : > { %p2109_p6 = por %p2108_p4, %p2107_p11 }
 0x28a   : > { %p2110_p8 = pnand %p2109_p6, %p2103_p5 }
 0x28c   : > { %2113 = shalt.err (!%p2110_p8)
}
 0x28d   : > { %1971 = dma.vmem_to_hbm [thread:$0]  (%p2286_p12), %s2519_s10, 16, %s2517_s15, %s1486_s16  }
 0x28e PF: > { %s1510_s24 = sand.u32 1, %s2144_s17   ;;  %p2584_p10 = scmp.ne.s32.totalorder %s2570_s23, 0 }
 0x28f   : > { %p2585_p13 = scmp.ge.s32.totalorder %s2156_s20, 2  ;;  %s1511_s9 = scalar_lea.sflag [#allocation5], %s1510_s24 }
 0x291   : > { %p1982_p3 = pnand %p2585_p13, %p2584_p10 }
 0x293   : > { %2139 = dma.done.wait (!%p1982_p3), %s1511_s9, 16  }
 0x294   : > { %2141 = vsyncadd (!%p1982_p3), %s1511_s9, 4294967280  ;;  %p19_p7 = scmp.ge.s32.totalorder %s2251_s28, 4   ;;  %s2586_s17 = smov %s2148_s18 }
 0x295   : > { %s2587_s18 = smov %s2152_s19  ;;  %s2588_s19 = smov %s2282_s21 }
 0x296   : > { %s2589_s20 = smov %s2251_s28  ;;  %21 = sbr.rel (!%p19_p7) target bundleno = 8 (0x8), region = 85 }
 0x29d   :  { %1515 = vsyncpa [#allocation4], 1 }
 0x29e   :  { %1517 = vsyncpa [#allocation4 + $0x1], 1 }
 0x29f   :  { %1518 = vsyncpa [#allocation7], 1 }
 0x2a0   :  { %1519 = vsyncpa [#allocation5], 1 }
 0x2a1   :  { %1521 = vsyncpa [#allocation5 + $0x1], 1 }

</bundles_post_ra>
